<compile_context>
chip_gen: v7x
topology: tpu7x:2x2x1
jax: 0.10.0
libtpu: 0.0.40
codegen_flags: <defaults>
</compile_context>

<pallas_src>
import functools

import jax
import jax.numpy as jnp
from jax.experimental import pallas as pl
from jax.experimental.pallas import tpu as pltpu

LANE = 128  # vreg lane width; only the hidden dim is padded to this.
# TODO(synk): on v6e/v7x a 256-multiple hidden pad would fill the 256-wide MXU
# better, but the kernel is HBM-bound at these widths so 128 is kept.


def _round_up(x, m):
    return ((x + m - 1) // m) * m


def _cdiv(a, b):
    return -(-a // b)


def _num_tensorcores():
    """Best-effort TensorCore count (v7x=2, v5e/v6e=1); never raises."""
    try:
        info = pltpu.get_tpu_info()
        for name in ("num_cores", "core_count", "num_tensorcores", "tensorcore_count"):
            v = getattr(info, name, None)
            if isinstance(v, int) and v > 0:
                return v
    except Exception:
        pass
    try:
        v = getattr(jax.devices()[0], "num_cores", None)
        if isinstance(v, int) and v > 0:
            return v
    except Exception:
        pass
    return 1


def _choose_tile_n(n, num_cores, max_tile=4096):
    """Row tile: as big as possible (amortize the ~0.35us/step grid overhead),
    but on multi-core chips keep >=2 grid steps per TensorCore so each core
    still overlaps prefetch-next / compute-current."""
    n8 = _round_up(max(n, 8), 8)
    tile = min(max_tile, n8)
    if num_cores > 1:
        per_core = _round_up(_cdiv(n8, 2 * num_cores), 8)
        tile = min(tile, max(per_core, 8))
    return max(tile, 8)


# ----------------------------- Pallas kernel -------------------------------

def _mlp_encoder_kernel(x_ref, w1_ref, b1_ref, w2_ref, b2_ref, o_ref):
    """Fused per-tile 2-layer MLP: o = relu(x@W1 + b1) @ W2 + b2.

    x is cast to bf16 in-kernel (MXU-native, f32 accumulation). The bias-add +
    ReLU + bf16 requantization is a single elementwise pass over the f32
    intermediate before the second MXU pass (no extra VMEM round trips).
    """
    x = x_ref[...].astype(jnp.bfloat16)
    h = jnp.dot(x, w1_ref[...], preferred_element_type=jnp.float32)
    h = jnp.maximum(h + b1_ref[...], 0.0).astype(w2_ref.dtype)
    o = jnp.dot(h, w2_ref[...], preferred_element_type=jnp.float32)
    o_ref[...] = (o + b2_ref[...]).astype(o_ref.dtype)


@functools.partial(jax.jit, static_argnames=("max_tile_n", "out_dtype"))
def mlp_encoder_pallas(x, w1, b1, w2, b2, *, max_tile_n=4096, out_dtype=None):
    """Apply the fused MLP encoder to vertex features x: [N, C_in] -> [N, C_out].

    x: [N, C_in] f32 (or bf16 to halve the input stream), w1: [C_in, H_p] bf16,
    b1: [1, H_p] f32, w2: [H_p, C_out] bf16, b2: [1, C_out] f32.
    Output dtype defaults to x.dtype (f32 in -> f32 out, PyTorch-module parity).
    """
    n, c_in = x.shape
    c_in_w, hidden_p = w1.shape
    assert c_in == c_in_w, "x / W1 channel mismatch"
    c_out = w2.shape[1]
    out_dtype = x.dtype if out_dtype is None else out_dtype
    x_itemsize = jnp.dtype(x.dtype).itemsize
    out_itemsize = jnp.dtype(out_dtype).itemsize
    w_itemsize = jnp.dtype(w1.dtype).itemsize

    tile_n = _choose_tile_n(n, _num_tensorcores(), max_tile=max_tile_n)
    grid = (_cdiv(n, tile_n),)

    # Resident operands: whole-array VMEM placement (single copy, no
    # per-step DMA, no double buffering).
    resident = pl.BlockSpec(memory_space=pltpu.MemorySpace.VMEM)

    # In-flight VMEM: double-buffered streamed x/out tiles, single-copy
    # resident weights, plus the per-tile intermediates.
    vmem_bytes = (
        2 * tile_n * c_in * x_itemsize              # x tiles (double-buffered)
        + 2 * tile_n * c_out * out_itemsize         # out tiles (double-buffered)
        + (c_in * hidden_p + hidden_p * c_out) * w_itemsize   # W1, W2 (resident)
        + (hidden_p + c_out) * 4                    # biases (f32)
        + tile_n * c_in * 2                         # bf16 copy of x tile
        + tile_n * hidden_p * (4 + 2)               # f32 h + bf16 requantized h
        + tile_n * c_out * 4                        # f32 o before cast
    )
    vmem_limit = int(min(max(2 * vmem_bytes, 32 * 1024 * 1024), 48 * 1024 * 1024))

    flops = 2 * n * (c_in * hidden_p + hidden_p * c_out)
    bytes_accessed = (
        n * c_in * x_itemsize + n * c_out * out_itemsize
        + (c_in * hidden_p + hidden_p * c_out) * w_itemsize
        + (hidden_p + c_out) * 4
    )

    return pl.pallas_call(
        _mlp_encoder_kernel,
        out_shape=jax.ShapeDtypeStruct((n, c_out), out_dtype),
        grid=grid,
        in_specs=[
            pl.BlockSpec((tile_n, c_in), lambda i: (i, 0)),  # streamed x tile
            resident,   # W1
            resident,   # b1
            resident,   # W2
            resident,   # b2
        ],
        out_specs=pl.BlockSpec((tile_n, c_out), lambda i: (i, 0)),
        compiler_params=pltpu.CompilerParams(
            dimension_semantics=("parallel",),
            vmem_limit_bytes=vmem_limit,
        ),
        cost_estimate=pl.CostEstimate(
            flops=flops, transcendentals=0, bytes_accessed=bytes_accessed),
    )(x, w1, b1, w2, b2)


# --------------------------- Module equivalents -----------------------------

class MLPSurfaceEncoder:
    """Concrete encoder (Linear -> ReLU -> Linear) over surface vertex features."""

    def __init__(self, in_dim, hidden_dim, out_dim, key):
        self.in_dim, self.hidden_dim, self.out_dim = in_dim, hidden_dim, out_dim
        k1, k2 = jax.random.split(key)
        # f32 master weights (Glorot-like scaling), kept for reference math.
        self.w1 = (jax.random.normal(k1, (in_dim, hidden_dim), jnp.float32)
                   / jnp.sqrt(in_dim))
        self.b1 = jnp.zeros((hidden_dim,), jnp.float32)
        self.w2 = (jax.random.normal(k2, (hidden_dim, out_dim), jnp.float32)
                   / jnp.sqrt(hidden_dim))
        self.b2 = jnp.zeros((out_dim,), jnp.float32)

        # Kernel-side copies: only the hidden dim is lane-padded (weights are
        # read once, so this padding is free); the x input and the output keep
        # their native channel widths -> no wrapper-side pad/slice passes.
        hid_p = _round_up(hidden_dim, LANE)
        pad_h = hid_p - hidden_dim
        self.w1_p = jnp.pad(self.w1, ((0, 0), (0, pad_h))).astype(jnp.bfloat16)
        self.b1_p = jnp.pad(self.b1, (0, pad_h))[None, :]          # f32
        self.w2_p = jnp.pad(self.w2, ((0, pad_h), (0, 0))).astype(jnp.bfloat16)
        self.b2_p = self.b2[None, :]                               # f32

    def __call__(self, surface):
        # `surface` is a dict carrying per-vertex features under "x"
        # (analogous to a torch_geometric Data object).
        x = surface["x"]
        new_x = mlp_encoder_pallas(x, self.w1_p, self.b1_p, self.w2_p, self.b2_p)
        out = dict(surface)
        out["x"] = new_x
        return out


class SurfaceEncoderBlock:
    """Exact translation of the PyTorch wrapper: forward(surface) = encoder(surface)."""

    def __init__(self, encoder):
        self.encoder = encoder

    def __call__(self, surface):
        surface = self.encoder(surface)
        return surface


# --------------------------------- Main -------------------------------------

if __name__ == "__main__":
    key = jax.random.PRNGKey(0)
    k_feat, k_enc = jax.random.split(key)

    # Small synthetic surface with a ragged vertex count (exercises the cdiv
    # grid / masked edge block): 250 vertices, 32 input channels.
    n_vertices, in_dim, hidden_dim, out_dim = 250, 32, 64, 32
    x = jax.random.normal(k_feat, (n_vertices, in_dim), jnp.float32)
    surface = {"x": x}

    encoder = MLPSurfaceEncoder(in_dim, hidden_dim, out_dim, k_enc)
    block = SurfaceEncoderBlock(encoder)

    out_surface = block(surface)
    out = jax.block_until_ready(out_surface["x"])

    # Pure-JAX reference replicating the kernel's numerics path
    # (bf16 operands, f32 accumulation, bf16 intermediate requantization).
    xq = x.astype(jnp.bfloat16).astype(jnp.float32)
    w1q = encoder.w1_p.astype(jnp.float32)
    w2q = encoder.w2_p.astype(jnp.float32)
    ref_h = jnp.maximum(xq @ w1q + encoder.b1_p, 0.0)
    ref_h = ref_h.astype(jnp.bfloat16).astype(jnp.float32)
    ref = ref_h @ w2q + encoder.b2_p

    assert out.shape == (n_vertices, out_dim)
    assert out.dtype == x.dtype
    assert jnp.allclose(out.astype(jnp.float32), ref, atol=2e-2, rtol=2e-2)

    print("KERNEL_OK")
</pallas_src>

<mosaic_0001>
module attributes {stable_mosaic.version = 11 : i64} {
  func.func @_mlp_encoder_kernel(%arg0: i32, %arg1: memref<256x32xf32, #tpu.memory_space<vmem>>, %arg2: memref<32x128xbf16, #tpu.memory_space<vmem>>, %arg3: memref<1x128xf32, #tpu.memory_space<vmem>>, %arg4: memref<128x32xbf16, #tpu.memory_space<vmem>>, %arg5: memref<1x32xf32, #tpu.memory_space<vmem>>, %arg6: memref<256x32xf32, #tpu.memory_space<vmem>>) attributes {dimension_semantics = [#tpu.dimension_semantics<parallel>], iteration_bounds = array<i64: 1>, scalar_prefetch = 0 : i64, scratch_operands = 0 : i64, tpu.core_type = #tpu.core_type<tc>, window_params = [{transform_indices = @transform_0, window_bounds = array<i64: 256, 32>}, {pipeline_mode = #tpu.pipeline_mode<synchronous>, transform_indices = @transform_1, window_bounds = array<i64: 32, 128>}, {pipeline_mode = #tpu.pipeline_mode<synchronous>, transform_indices = @transform_2, window_bounds = array<i64: 1, 128>}, {pipeline_mode = #tpu.pipeline_mode<synchronous>, transform_indices = @transform_3, window_bounds = array<i64: 128, 32>}, {pipeline_mode = #tpu.pipeline_mode<synchronous>, transform_indices = @transform_4, window_bounds = array<i64: 1, 32>}, {transform_indices = @transform_5, window_bounds = array<i64: 256, 32>}]} {
    %c0 = arith.constant 0 : index
    %c0_0 = arith.constant 0 : index
    %0 = vector.load %arg1[%c0, %c0_0] : memref<256x32xf32, #tpu.memory_space<vmem>>, vector<256x32xf32>
    %1 = arith.truncf %0 : vector<256x32xf32> to vector<256x32xbf16>
    %c0_1 = arith.constant 0 : index
    %c0_2 = arith.constant 0 : index
    %2 = vector.load %arg2[%c0_1, %c0_2] : memref<32x128xbf16, #tpu.memory_space<vmem>>, vector<32x128xbf16>
    %cst = arith.constant dense<0.000000e+00> : vector<256x128xf32>
    %3 = tpu.matmul %1, %2, %cst {dimension_numbers = #tpu.dot_dimension_numbers<[1], [0], [0], [1], [0, 0, 1, 1], [], []>} : vector<256x32xbf16>, vector<32x128xbf16>, vector<256x128xf32> -> vector<256x128xf32>
    %c0_3 = arith.constant 0 : index
    %c0_4 = arith.constant 0 : index
    %4 = vector.load %arg3[%c0_3, %c0_4] : memref<1x128xf32, #tpu.memory_space<vmem>>, vector<1x128xf32>
    %5 = vector.broadcast %4 : vector<1x128xf32> to vector<256x128xf32>
    %6 = arith.addf %3, %5 : vector<256x128xf32>
    %cst_5 = arith.constant 0.000000e+00 : f32
    %7 = vector.broadcast %cst_5 : f32 to vector<256x128xf32>
    %8 = arith.maximumf %6, %7 : vector<256x128xf32>
    %9 = arith.truncf %8 : vector<256x128xf32> to vector<256x128xbf16>
    %c0_6 = arith.constant 0 : index
    %c0_7 = arith.constant 0 : index
    %10 = vector.load %arg4[%c0_6, %c0_7] : memref<128x32xbf16, #tpu.memory_space<vmem>>, vector<128x32xbf16>
    %cst_8 = arith.constant dense<0.000000e+00> : vector<256x32xf32>
    %11 = tpu.matmul %9, %10, %cst_8 {dimension_numbers = #tpu.dot_dimension_numbers<[1], [0], [0], [1], [0, 0, 1, 1], [], []>} : vector<256x128xbf16>, vector<128x32xbf16>, vector<256x32xf32> -> vector<256x32xf32>
    %c0_9 = arith.constant 0 : index
    %c0_10 = arith.constant 0 : index
    %12 = vector.load %arg5[%c0_9, %c0_10] : memref<1x32xf32, #tpu.memory_space<vmem>>, vector<1x32xf32>
    %13 = vector.broadcast %12 : vector<1x32xf32> to vector<256x32xf32>
    %14 = arith.addf %11, %13 : vector<256x32xf32>
    %c0_11 = arith.constant 0 : index
    %c0_12 = arith.constant 0 : index
    %15 = vector.load %arg6[%c0_11, %c0_12] : memref<256x32xf32, #tpu.memory_space<vmem>>, vector<256x32xf32>
    tpu.vector_store %arg6[%c0_11, %c0_12], %14 {strides = array<i32>} : memref<256x32xf32, #tpu.memory_space<vmem>>, vector<256x32xf32>,
    return
  }
  func.func @transform_0(%arg0: i32) -> (i32, i32) {
    %c0_i32 = arith.constant 0 : i32
    %c0_i32_0 = arith.constant 0 : i32
    return %arg0, %c0_i32 : i32, i32
  }
  func.func @transform_1(%arg0: i32) -> (i32, i32) {
    %c0_i32 = arith.constant 0 : i32
    %c0_i32_0 = arith.constant 0 : i32
    %c0_i32_1 = arith.constant 0 : i32
    return %c0_i32, %c0_i32_0 : i32, i32
  }
  func.func @transform_2(%arg0: i32) -> (i32, i32) {
    %c0_i32 = arith.constant 0 : i32
    %c0_i32_0 = arith.constant 0 : i32
    %c0_i32_1 = arith.constant 0 : i32
    return %c0_i32, %c0_i32_0 : i32, i32
  }
  func.func @transform_3(%arg0: i32) -> (i32, i32) {
    %c0_i32 = arith.constant 0 : i32
    %c0_i32_0 = arith.constant 0 : i32
    %c0_i32_1 = arith.constant 0 : i32
    return %c0_i32, %c0_i32_0 : i32, i32
  }
  func.func @transform_4(%arg0: i32) -> (i32, i32) {
    %c0_i32 = arith.constant 0 : i32
    %c0_i32_0 = arith.constant 0 : i32
    %c0_i32_1 = arith.constant 0 : i32
    return %c0_i32, %c0_i32_0 : i32, i32
  }
  func.func @transform_5(%arg0: i32) -> (i32, i32) {
    %c0_i32 = arith.constant 0 : i32
    %c0_i32_0 = arith.constant 0 : i32
    return %arg0, %c0_i32 : i32, i32
  }
}

</mosaic_0001>

<bundles_post_ra>
// kernel: mlp_encoder_pallas.1
= control target key start
LH: loop header
LB: loop body
LE: loop exit
PB: predicated region body
PF: predicated region fallthrough
CT: control target
= control target key end

     0   :  { %vm92_vm0 = vcmask 261120   ;;  %s1172_s1 = inlined_call_operand.vmem [shape: bf16[32,128], index: 1, kind: input, shape index: {}]   ;;  %s1173_s0 = inlined_call_operand.vmem [shape: f32[250,32], index: 0, kind: input, shape index: {}]   ;;  %s1174_s3 = inlined_call_operand.vmem [shape: bf16[128,32], index: 3, kind: input, shape index: {}]   ;;  %s1175_s2 = inlined_call_operand.vmem [shape: f32[1,128], index: 2, kind: input, shape index: {}]   ;;  %s1176_s4 = inlined_call_operand.vmem [shape: f32[1,32], index: 4, kind: input, shape index: {}]   ;;  %s1177_s5 = inlined_call_operand.vmem [shape: f32[250,32], index: 5, kind: output, shape index: {}]  }
   0x1   :  { %v788_v0 = vld [vmem:[%s1172_s1] sm:$0xff]   ;;  %v789_v1 = vld [vmem:[%s1172_s1 + $0x8] sm:$0xff]   ;;  %v23_v5 = vld [vmem:[%s1173_s0 + $0x10] sm:$0xff] }
   0x2   :  { %688 = vmatprep.subr.bf16.mxu0 %v788_v0  ;;  %v21_v2 = vld [vmem:[%s1173_s0] sm:$0xff]  ;;  %v22_v3 = vld [vmem:[%s1173_s0 + $0x8] sm:$0xff]  ;;  %v24_v6 = vld [vmem:[%s1173_s0 + $0x18] sm:$0xff] }
   0x3   :  { %689 = vmatpush3.bf16.msra.mxu0 %v788_v0  ;;  %v53_v4 = vpack.c.bf16 %v22_v3, %v21_v2  ;;  %v25_v7 = vld [vmem:[%s1173_s0 + $0x20] sm:$0xff]  ;;  %v26_v8 = vld [vmem:[%s1173_s0 + $0x28] sm:$0xff]  ;;  %v54_v9 = vpack.c.bf16 %v24_v6, %v23_v5  ;;  %v27_v11 = vld [vmem:[%s1173_s0 + $0x30] sm:$0xff] }
   0x4   :  { %690 = vmatprep.subr.bf16.mxu0 %v789_v1  ;;  %v55_v10 = vpack.c.bf16 %v26_v8, %v25_v7  ;;  %v28_v12 = vld [vmem:[%s1173_s0 + $0x38] sm:$0xff]  ;;  %v29_v13 = vld [vmem:[%s1173_s0 + $0x40] sm:$0xff]  ;;  %v30_v14 = vld [vmem:[%s1173_s0 + $0x48] sm:$0xff] }
   0x5   :  { %692 = vmatprep.mubr.msk.bf16.mxu0 %vm92_vm0, %v53_v4  ;;  %v790_v15 = vld [vmem:[%s1174_s3] sm:$0xff]   ;;  %v56_v16 = vpack.c.bf16 %v28_v12, %v27_v11  ;;  %v791_v17 = vld [vmem:[%s1174_s3 + $0x8] sm:$0xff]   ;;  %v57_v18 = vpack.c.bf16 %v30_v14, %v29_v13  ;;  %v31_v19 = vld [vmem:[%s1173_s0 + $0x50] sm:$0xff] }
   0x6   :  { %772 = vmatprep.subr.bf16.mxu1 %v790_v15  ;;  %v792_v20 = vld [vmem:[%s1174_s3 + $0x10] sm:$0xff]   ;;  %v32_v21 = vld [vmem:[%s1173_s0 + $0x58] sm:$0xff]  ;;  %v33_v22 = vld [vmem:[%s1173_s0 + $0x60] sm:$0xff] }
   0x7   :  { %691 = vmatpush3.bf16.msra.mxu0 %v789_v1  ;;  %780 = vmatpush3.bf16.msra.mxu1 %v790_v15  ;;  %v34_v23 = vld [vmem:[%s1173_s0 + $0x68] sm:$0xff]  ;;  %v793_v24 = vld [vmem:[%s1174_s3 + $0x18] sm:$0xff]   ;;  %v58_v25 = vpack.c.bf16 %v32_v21, %v31_v19  ;;  %v794_v27 = vld [vmem:[%s1174_s3 + $0x20] sm:$0xff]  }
   0x8   :  { %724 = vmatprep.subr.bf16.mxu0 %v790_v15  ;;  %773 = vmatprep.subr.bf16.mxu1 %v791_v17  ;;  %v59_v26 = vpack.c.bf16 %v34_v23, %v33_v22  ;;  %v35_v28 = vld [vmem:[%s1173_s0 + $0x70] sm:$0xff]  ;;  %v36_v29 = vld [vmem:[%s1173_s0 + $0x78] sm:$0xff]  ;;  %v37_v30 = vld [vmem:[%s1173_s0 + $0x80] sm:$0xff] }
   0x9   :  { %v38_v31 = vld [vmem:[%s1173_s0 + $0x88] sm:$0xff]  ;;  %v60_v33 = vpack.c.bf16 %v36_v29, %v35_v28  ;;  %v39_v35 = vld [vmem:[%s1173_s0 + $0x90] sm:$0xff]  ;;  %v40_v36 = vld [vmem:[%s1173_s0 + $0x98] sm:$0xff] }
   0xa   :  { %693 = vmatmul.mubr.msk.bf16.vlgmr.msra.gmra.mrb[0].mxu0 %vm92_vm0, %v54_v9  ;;  %v795_v32 = vld [vmem:[%s1174_s3 + $0x28] sm:$0xff]   ;;  %v61_v34 = vpack.c.bf16 %v38_v31, %v37_v30  ;;  %v41_v37 = vld [vmem:[%s1173_s0 + $0xa0] sm:$0xff]  ;;  %v62_v39 = vpack.c.bf16 %v40_v36, %v39_v35  ;;  %v43_v41 = vld [vmem:[%s1173_s0 + $0xb0] sm:$0xff] }
   0xb   :  { %696 = vmatprep.mubr.msk.bf16.mxu0 %vm92_vm0, %v55_v10  ;;  %725 = vmatpush3.bf16.msra.mxu0 %v790_v15  ;;  %v42_v38 = vld [vmem:[%s1173_s0 + $0xa8] sm:$0xff]  ;;  %v44_v42 = vld [vmem:[%s1173_s0 + $0xb8] sm:$0xff]  ;;  %v45_v43 = vld [vmem:[%s1173_s0 + $0xc0] sm:$0xff] }
   0xc   :  { %726 = vmatprep.subr.bf16.mxu0 %v791_v17  ;;  %781 = vmatpush3.bf16.msra.mxu1 %v791_v17  ;;  %v63_v40 = vpack.c.bf16 %v42_v38, %v41_v37  ;;  %v46_v44 = vld [vmem:[%s1173_s0 + $0xc8] sm:$0xff]  ;;  %v64_v45 = vpack.c.bf16 %v44_v42, %v43_v41  ;;  %v47_v47 = vld [vmem:[%s1173_s0 + $0xd0] sm:$0xff]  ;;  %v48_v48 = vld [vmem:[%s1173_s0 + $0xd8] sm:$0xff] }
   0xd   :  { %774 = vmatprep.subr.bf16.mxu1 %v792_v20  ;;  %v65_v46 = vpack.c.bf16 %v46_v44, %v45_v43  ;;  %v49_v49 = vld [vmem:[%s1173_s0 + $0xe0] sm:$0xff]  ;;  %v50_v50 = vld [vmem:[%s1173_s0 + $0xe8] sm:$0xff]  ;;  %v66_v51 = vpack.c.bf16 %v48_v48, %v47_v47  ;;  %v51_v53 = vld [vmem:[%s1173_s0 + $0xf0] sm:$0xff] }
   0xe   :  { %v67_v52 = vpack.c.bf16 %v50_v50, %v49_v49  ;;  %v52_v54 = vld [vmem:[%s1173_s0 + $0xf8] sm:$0xff]  ;;  %v796_v56 = vld [vmem:[%s1174_s3 + $0x30] sm:$0xff]   ;;  %v973_v58 = vld [vmem:[%s1175_s2] ss:$0 sm:$0xff] }
   0xf   :  { %727 = vmatpush3.bf16.msra.mxu0 %v791_v17  ;;  %v68_v55 = vpack.c.bf16 %v52_v54, %v51_v53  ;;  %v797_v57 = vld [vmem:[%s1174_s3 + $0x38] sm:$0xff]  }
  0x10   :  { %728 = vmatprep.subr.bf16.mxu0 %v792_v20  ;;  %782 = vmatpush3.bf16.msra.mxu1 %v792_v20 }
  0x11   :  { %775 = vmatprep.subr.bf16.mxu1 %v793_v24 }
  0x12   :  { %697 = vmatmul.mubr.msk.bf16.gmra.mrb[4].mxu0 %vm92_vm0, %v56_v16 }
  0x13   :  { %700 = vmatprep.mubr.msk.bf16.mxu0 %vm92_vm0, %v57_v18  ;;  %729 = vmatpush3.bf16.msra.mxu0 %v792_v20 }
  0x14   :  { %730 = vmatprep.subr.bf16.mxu0 %v793_v24  ;;  %783 = vmatpush3.bf16.msra.mxu1 %v793_v24 }
  0x15   :  { %776 = vmatprep.subr.bf16.mxu1 %v794_v27 }
  0x17   :  { %731 = vmatpush3.bf16.msra.mxu0 %v793_v24 }
  0x18   :  { %732 = vmatprep.subr.bf16.mxu0 %v794_v27  ;;  %784 = vmatpush3.bf16.msra.mxu1 %v794_v27 }
  0x19   :  { %777 = vmatprep.subr.bf16.mxu1 %v795_v32 }
  0x1a   :  { %701 = vmatmul.mubr.msk.bf16.gmra.mrb[8].mxu0 %vm92_vm0, %v58_v25 }
  0x1b   :  { %704 = vmatprep.mubr.msk.bf16.mxu0 %vm92_vm0, %v59_v26  ;;  %733 = vmatpush3.bf16.msra.mxu0 %v794_v27 }
  0x1c   :  { %734 = vmatprep.subr.bf16.mxu0 %v795_v32  ;;  %785 = vmatpush3.bf16.msra.mxu1 %v795_v32 }
  0x1d   :  { %778 = vmatprep.subr.bf16.mxu1 %v796_v56 }
  0x1f   :  { %735 = vmatpush3.bf16.msra.mxu0 %v795_v32 }
  0x20   :  { %736 = vmatprep.subr.bf16.mxu0 %v796_v56  ;;  %786 = vmatpush3.bf16.msra.mxu1 %v796_v56 }
  0x21   :  { %779 = vmatprep.subr.bf16.mxu1 %v797_v57 }
  0x22   :  { %705 = vmatmul.mubr.msk.bf16.gmra.mrb[12].mxu0 %vm92_vm0, %v60_v33 }
  0x23   :  { %708 = vmatprep.mubr.msk.bf16.mxu0 %vm92_vm0, %v61_v34  ;;  %737 = vmatpush3.bf16.msra.mxu0 %v796_v56 }
  0x24   :  { %738 = vmatprep.subr.bf16.mxu0 %v797_v57  ;;  %787 = vmatpush3.bf16.msra.mxu1 %v797_v57 }
  0x27   :  { %739 = vmatpush3.bf16.msra.mxu0 %v797_v57 }
  0x2a   :  { %709 = vmatmul.mubr.msk.bf16.gmra.mrb[16].mxu0 %vm92_vm0, %v62_v39 }
  0x2b   :  { %712 = vmatprep.mubr.msk.bf16.mxu0 %vm92_vm0, %v63_v40 }
  0x32   :  { %713 = vmatmul.mubr.msk.bf16.gmra.mrb[20].mxu0 %vm92_vm0, %v64_v45 }
  0x33   :  { %716 = vmatprep.mubr.msk.bf16.mxu0 %vm92_vm0, %v65_v46 }
  0x3a   :  { %717 = vmatmul.mubr.msk.bf16.gmra.mrb[24].mxu0 %vm92_vm0, %v66_v51 }
  0x3b   :  { %720 = vmatprep.mubr.msk.bf16.mxu0 %vm92_vm0, %v67_v52 }
  0x42   :  { %721 = vmatmul.mubr.msk.bf16.gmra.mrb[28].mxu0 %vm92_vm0, %v68_v55 }
  0xdd   :  { %v694_v59 = vpop.f32.mrb[0].mxu0 }
  0xde   :  { %v184_v60 = vadd.f32 %v694_v59, %v973_v58  ;;  %v175_v61 = vpop.f32.mrb[1].mxu0 }
  0xdf   :  { %v176_v62 = vadd.f32 %v973_v58, %v175_v61  ;;  %v695_v63 = vpop.f32.mrb[2].mxu0 }
  0xe0   :  { %v187_v0 = vadd.f32 %v695_v63, %v973_v58  ;;  %v178_v1 = vpop.f32.mrb[3].mxu0  ;;  %v304_v3 = vmax.f32 %v184_v60, 0.0 }
  0xe1   :  { %v179_v2 = vadd.f32 %v973_v58, %v178_v1  ;;  %v302_v5 = vmax.f32 %v176_v62, 0.0 }
  0xe2   :  { %v305_v4 = vmax.f32 %v187_v0, 0.0 }
  0xe3   :  { %v303_v6 = vmax.f32 %v179_v2, 0.0 }
  0xe4   :  { %v335_v7 = vpack.c.bf16 %v305_v4, %v304_v3 }
  0xe5   :  { %v334_v8 = vpack.c.bf16 %v303_v6, %v302_v5  ;;  %v698_v9 = vpop.f32.mrb[4].mxu0 }
  0xe6   :  { %v200_v10 = vadd.f32 %v698_v9, %v973_v58  ;;  %v191_v11 = vpop.f32.mrb[5].mxu0 }
  0xe7   :  { %v192_v12 = vadd.f32 %v973_v58, %v191_v11  ;;  %v699_v13 = vpop.f32.mrb[6].mxu0  ;;  %740 = vmatprep.mubr.bf16.mxu0 %v334_v8 }
  0xe8   :  { %v203_v14 = vadd.f32 %v699_v13, %v973_v58  ;;  %v194_v15 = vpop.f32.mrb[7].mxu0  ;;  %741 = vmatmul.mubr.bf16.vlgmr.msra.gmra.mrb[32].mxu0 %v335_v7  ;;  %v308_v17 = vmax.f32 %v200_v10, 0.0 }
  0xe9   :  { %v195_v16 = vadd.f32 %v973_v58, %v194_v15  ;;  %v306_v19 = vmax.f32 %v192_v12, 0.0 }
  0xea   :  { %v309_v18 = vmax.f32 %v203_v14, 0.0 }
  0xeb   :  { %v307_v20 = vmax.f32 %v195_v16, 0.0 }
  0xec   :  { %v337_v21 = vpack.c.bf16 %v309_v18, %v308_v17 }
  0xed   :  { %v702_v22 = vpop.f32.mrb[8].mxu0  ;;  %v336_v23 = vpack.c.bf16 %v307_v20, %v306_v19 }
  0xee   :  { %v216_v24 = vadd.f32 %v702_v22, %v973_v58  ;;  %v207_v25 = vpop.f32.mrb[9].mxu0 }
  0xef   :  { %v208_v26 = vadd.f32 %v973_v58, %v207_v25  ;;  %v703_v27 = vpop.f32.mrb[10].mxu0  ;;  %744 = vmatprep.mubr.bf16.mxu1 %v336_v23 }
  0xf0   :  { %v219_v28 = vadd.f32 %v703_v27, %v973_v58  ;;  %v210_v29 = vpop.f32.mrb[11].mxu0  ;;  %745 = vmatmul.mubr.bf16.vlgmr.msra.gmra.mrb[0].mxu1 %v337_v21  ;;  %v312_v31 = vmax.f32 %v216_v24, 0.0 }
  0xf1   :  { %v211_v30 = vadd.f32 %v973_v58, %v210_v29  ;;  %v310_v33 = vmax.f32 %v208_v26, 0.0 }
  0xf2   :  { %v313_v32 = vmax.f32 %v219_v28, 0.0 }
  0xf3   :  { %v311_v34 = vmax.f32 %v211_v30, 0.0 }
  0xf4   :  { %v339_v35 = vpack.c.bf16 %v313_v32, %v312_v31 }
  0xf5   :  { %v338_v36 = vpack.c.bf16 %v311_v34, %v310_v33  ;;  %v706_v37 = vpop.f32.mrb[12].mxu0 }
  0xf6   :  { %v232_v38 = vadd.f32 %v706_v37, %v973_v58  ;;  %v223_v39 = vpop.f32.mrb[13].mxu0 }
  0xf7   :  { %v224_v40 = vadd.f32 %v973_v58, %v223_v39  ;;  %v707_v41 = vpop.f32.mrb[14].mxu0  ;;  %748 = vmatprep.mubr.bf16.mxu1 %v338_v36 }
  0xf8   :  { %v235_v42 = vadd.f32 %v707_v41, %v973_v58  ;;  %v226_v43 = vpop.f32.mrb[15].mxu0  ;;  %749 = vmatmul.mubr.bf16.gmra.mrb[4].mxu1 %v339_v35  ;;  %v316_v45 = vmax.f32 %v232_v38, 0.0 }
  0xf9   :  { %v227_v44 = vadd.f32 %v973_v58, %v226_v43  ;;  %v314_v47 = vmax.f32 %v224_v40, 0.0 }
  0xfa   :  { %v317_v46 = vmax.f32 %v235_v42, 0.0 }
  0xfb   :  { %v315_v48 = vmax.f32 %v227_v44, 0.0  ;;  %v1010_v44 = vld [vmem:[%s1176_s4] ss:$0 sm:$0xff] }
  0xfc   :  { %v341_v49 = vpack.c.bf16 %v317_v46, %v316_v45 }
  0xfd   :  { %v340_v50 = vpack.c.bf16 %v315_v48, %v314_v47  ;;  %v710_v51 = vpop.f32.mrb[16].mxu0 }
  0xfe   :  { %v248_v52 = vadd.f32 %v710_v51, %v973_v58  ;;  %v239_v53 = vpop.f32.mrb[17].mxu0 }
  0xff   :  { %v240_v54 = vadd.f32 %v973_v58, %v239_v53  ;;  %v711_v55 = vpop.f32.mrb[18].mxu0  ;;  %752 = vmatprep.mubr.bf16.mxu1 %v340_v50 }
 0x100   :  { %v251_v56 = vadd.f32 %v711_v55, %v973_v58  ;;  %v242_v57 = vpop.f32.mrb[19].mxu0  ;;  %753 = vmatmul.mubr.bf16.gmra.mrb[8].mxu1 %v341_v49  ;;  %v320_v60 = vmax.f32 %v248_v52, 0.0 }
 0x101   :  { %v243_v59 = vadd.f32 %v973_v58, %v242_v57  ;;  %v318_v62 = vmax.f32 %v240_v54, 0.0 }
 0x102   :  { %v321_v61 = vmax.f32 %v251_v56, 0.0 }
 0x103   :  { %v319_v63 = vmax.f32 %v243_v59, 0.0 }
 0x104   :  { %v343_v0 = vpack.c.bf16 %v321_v61, %v320_v60 }
 0x105   :  { %v342_v1 = vpack.c.bf16 %v319_v63, %v318_v62  ;;  %v714_v2 = vpop.f32.mrb[20].mxu0 }
 0x106   :  { %v264_v3 = vadd.f32 %v714_v2, %v973_v58  ;;  %v255_v4 = vpop.f32.mrb[21].mxu0 }
 0x107   :  { %v256_v5 = vadd.f32 %v973_v58, %v255_v4  ;;  %v715_v6 = vpop.f32.mrb[22].mxu0  ;;  %756 = vmatprep.mubr.bf16.mxu1 %v342_v1 }
 0x108   :  { %v267_v7 = vadd.f32 %v715_v6, %v973_v58  ;;  %v258_v8 = vpop.f32.mrb[23].mxu0  ;;  %757 = vmatmul.mubr.bf16.gmra.mrb[12].mxu1 %v343_v0  ;;  %v324_v10 = vmax.f32 %v264_v3, 0.0 }
 0x109   :  { %v259_v9 = vadd.f32 %v973_v58, %v258_v8  ;;  %v322_v12 = vmax.f32 %v256_v5, 0.0 }
 0x10a   :  { %v325_v11 = vmax.f32 %v267_v7, 0.0 }
 0x10b   :  { %v323_v13 = vmax.f32 %v259_v9, 0.0 }
 0x10c   :  { %v345_v14 = vpack.c.bf16 %v325_v11, %v324_v10 }
 0x10d   :  { %v344_v15 = vpack.c.bf16 %v323_v13, %v322_v12  ;;  %v718_v16 = vpop.f32.mrb[24].mxu0 }
 0x10e   :  { %v280_v17 = vadd.f32 %v718_v16, %v973_v58  ;;  %v271_v18 = vpop.f32.mrb[25].mxu0 }
 0x10f   :  { %v272_v19 = vadd.f32 %v973_v58, %v271_v18  ;;  %v719_v20 = vpop.f32.mrb[26].mxu0  ;;  %760 = vmatprep.mubr.bf16.mxu1 %v344_v15 }
 0x110   :  { %v283_v21 = vadd.f32 %v719_v20, %v973_v58  ;;  %v274_v22 = vpop.f32.mrb[27].mxu0  ;;  %761 = vmatmul.mubr.bf16.gmra.mrb[16].mxu1 %v345_v14  ;;  %v328_v24 = vmax.f32 %v280_v17, 0.0 }
 0x111   :  { %v275_v23 = vadd.f32 %v973_v58, %v274_v22  ;;  %v326_v26 = vmax.f32 %v272_v19, 0.0 }
 0x112   :  { %v329_v25 = vmax.f32 %v283_v21, 0.0 }
 0x113   :  { %v327_v27 = vmax.f32 %v275_v23, 0.0 }
 0x114   :  { %v347_v28 = vpack.c.bf16 %v329_v25, %v328_v24 }
 0x115   :  { %v346_v29 = vpack.c.bf16 %v327_v27, %v326_v26  ;;  %v722_v30 = vpop.f32.mrb[28].mxu0 }
 0x116   :  { %v296_v31 = vadd.f32 %v722_v30, %v973_v58  ;;  %v287_v32 = vpop.f32.mrb[29].mxu0 }
 0x117   :  { %v288_v33 = vadd.f32 %v973_v58, %v287_v32  ;;  %v723_v34 = vpop.f32.mrb[30].mxu0  ;;  %764 = vmatprep.mubr.bf16.mxu1 %v346_v29 }
 0x118   :  { %v299_v35 = vadd.f32 %v723_v34, %v973_v58  ;;  %v290_v36 = vpop.f32.mrb[31].mxu0  ;;  %765 = vmatmul.mubr.bf16.gmra.mrb[20].mxu1 %v347_v28  ;;  %v332_v38 = vmax.f32 %v296_v31, 0.0 }
 0x119   :  { %v291_v37 = vadd.f32 %v973_v58, %v290_v36  ;;  %v330_v40 = vmax.f32 %v288_v33, 0.0 }
 0x11a   :  { %v333_v39 = vmax.f32 %v299_v35, 0.0 }
 0x11b   :  { %v331_v41 = vmax.f32 %v291_v37, 0.0 }
 0x11c   :  { %v349_v42 = vpack.c.bf16 %v333_v39, %v332_v38 }
 0x11d   :  { %v348_v43 = vpack.c.bf16 %v331_v41, %v330_v40 }
 0x11f   :  { %768 = vmatprep.mubr.bf16.mxu1 %v348_v43 }
 0x120   :  { %769 = vmatmul.mubr.bf16.gmra.mrb[24].mxu1 %v349_v42 }
 0x1bb   :  { %v742_v45 = vpop.f32.mrb[32].mxu0 }
 0x1bc   :  { %v464_v46 = vadd.f32 %v742_v45, %v1010_v44  ;;  %v455_v47 = vpop.f32.mrb[33].mxu0 }
 0x1bd   :  { %v456_v48 = vadd.f32 %v1010_v44, %v455_v47  ;;  %v743_v58 = vpop.f32.mrb[34].mxu0 }
 0x1be   :  { %584 = vst.msk [vmem:[%s1177_s5 + $0x10] sm:$0xff] %vm92_vm0, %v464_v46  ;;  %v467_v49 = vadd.f32 %v743_v58, %v1010_v44  ;;  %v458_v50 = vpop.f32.mrb[35].mxu0 }
 0x1bf   :  { %582 = vst.msk [vmem:[%s1177_s5] sm:$0xff] %vm92_vm0, %v456_v48  ;;  %v459_v51 = vadd.f32 %v1010_v44, %v458_v50 }
 0x1c0   :  { %585 = vst.msk [vmem:[%s1177_s5 + $0x18] sm:$0xff] %vm92_vm0, %v467_v49 }
 0x1c1   :  { %583 = vst.msk [vmem:[%s1177_s5 + $0x8] sm:$0xff] %vm92_vm0, %v459_v51 }
 0x1c3   :  { %v746_v52 = vpop.f32.mrb[0].mxu1 }
 0x1c4   :  { %v480_v53 = vadd.f32 %v746_v52, %v1010_v44  ;;  %v471_v54 = vpop.f32.mrb[1].mxu1 }
 0x1c5   :  { %v472_v55 = vadd.f32 %v1010_v44, %v471_v54  ;;  %v747_v56 = vpop.f32.mrb[2].mxu1 }
 0x1c6   :  { %588 = vst.msk [vmem:[%s1177_s5 + $0x30] sm:$0xff] %vm92_vm0, %v480_v53  ;;  %v483_v57 = vadd.f32 %v747_v56, %v1010_v44  ;;  %v474_v59 = vpop.f32.mrb[3].mxu1 }
 0x1c7   :  { %586 = vst.msk [vmem:[%s1177_s5 + $0x20] sm:$0xff] %vm92_vm0, %v472_v55  ;;  %v475_v60 = vadd.f32 %v1010_v44, %v474_v59 }
 0x1c8   :  { %589 = vst.msk [vmem:[%s1177_s5 + $0x38] sm:$0xff] %vm92_vm0, %v483_v57 }
 0x1c9   :  { %587 = vst.msk [vmem:[%s1177_s5 + $0x28] sm:$0xff] %vm92_vm0, %v475_v60 }
 0x1cb   :  { %v750_v61 = vpop.f32.mrb[4].mxu1 }
 0x1cc   :  { %v496_v62 = vadd.f32 %v750_v61, %v1010_v44  ;;  %v487_v63 = vpop.f32.mrb[5].mxu1 }
 0x1cd   :  { %v488_v0 = vadd.f32 %v1010_v44, %v487_v63  ;;  %v751_v1 = vpop.f32.mrb[6].mxu1 }
 0x1ce   :  { %592 = vst.msk [vmem:[%s1177_s5 + $0x50] sm:$0xff] %vm92_vm0, %v496_v62  ;;  %v499_v2 = vadd.f32 %v751_v1, %v1010_v44  ;;  %v490_v3 = vpop.f32.mrb[7].mxu1 }
 0x1cf   :  { %590 = vst.msk [vmem:[%s1177_s5 + $0x40] sm:$0xff] %vm92_vm0, %v488_v0  ;;  %v491_v4 = vadd.f32 %v1010_v44, %v490_v3 }
 0x1d0   :  { %593 = vst.msk [vmem:[%s1177_s5 + $0x58] sm:$0xff] %vm92_vm0, %v499_v2 }
 0x1d1   :  { %591 = vst.msk [vmem:[%s1177_s5 + $0x48] sm:$0xff] %vm92_vm0, %v491_v4 }
 0x1d3   :  { %v754_v5 = vpop.f32.mrb[8].mxu1 }
 0x1d4   :  { %v512_v6 = vadd.f32 %v754_v5, %v1010_v44  ;;  %v503_v7 = vpop.f32.mrb[9].mxu1 }
 0x1d5   :  { %v504_v8 = vadd.f32 %v1010_v44, %v503_v7  ;;  %v755_v9 = vpop.f32.mrb[10].mxu1 }
 0x1d6   :  { %596 = vst.msk [vmem:[%s1177_s5 + $0x70] sm:$0xff] %vm92_vm0, %v512_v6  ;;  %v515_v10 = vadd.f32 %v755_v9, %v1010_v44  ;;  %v506_v11 = vpop.f32.mrb[11].mxu1 }
 0x1d7   :  { %594 = vst.msk [vmem:[%s1177_s5 + $0x60] sm:$0xff] %vm92_vm0, %v504_v8  ;;  %v507_v12 = vadd.f32 %v1010_v44, %v506_v11 }
 0x1d8   :  { %597 = vst.msk [vmem:[%s1177_s5 + $0x78] sm:$0xff] %vm92_vm0, %v515_v10 }
 0x1d9   :  { %595 = vst.msk [vmem:[%s1177_s5 + $0x68] sm:$0xff] %vm92_vm0, %v507_v12 }
 0x1db   :  { %v758_v13 = vpop.f32.mrb[12].mxu1 }
 0x1dc   :  { %v528_v14 = vadd.f32 %v758_v13, %v1010_v44  ;;  %v519_v15 = vpop.f32.mrb[13].mxu1 }
 0x1dd   :  { %v520_v16 = vadd.f32 %v1010_v44, %v519_v15  ;;  %v759_v17 = vpop.f32.mrb[14].mxu1 }
 0x1de   :  { %600 = vst.msk [vmem:[%s1177_s5 + $0x90] sm:$0xff] %vm92_vm0, %v528_v14  ;;  %v531_v18 = vadd.f32 %v759_v17, %v1010_v44  ;;  %v522_v19 = vpop.f32.mrb[15].mxu1 }
 0x1df   :  { %598 = vst.msk [vmem:[%s1177_s5 + $0x80] sm:$0xff] %vm92_vm0, %v520_v16  ;;  %v523_v20 = vadd.f32 %v1010_v44, %v522_v19 }
 0x1e0   :  { %601 = vst.msk [vmem:[%s1177_s5 + $0x98] sm:$0xff] %vm92_vm0, %v531_v18 }
 0x1e1   :  { %599 = vst.msk [vmem:[%s1177_s5 + $0x88] sm:$0xff] %vm92_vm0, %v523_v20 }
 0x1e3   :  { %v762_v21 = vpop.f32.mrb[16].mxu1 }
 0x1e4   :  { %v544_v22 = vadd.f32 %v762_v21, %v1010_v44  ;;  %v535_v23 = vpop.f32.mrb[17].mxu1 }
 0x1e5   :  { %v536_v24 = vadd.f32 %v1010_v44, %v535_v23  ;;  %v763_v25 = vpop.f32.mrb[18].mxu1 }
 0x1e6   :  { %604 = vst.msk [vmem:[%s1177_s5 + $0xb0] sm:$0xff] %vm92_vm0, %v544_v22  ;;  %v547_v26 = vadd.f32 %v763_v25, %v1010_v44  ;;  %v538_v27 = vpop.f32.mrb[19].mxu1 }
 0x1e7   :  { %602 = vst.msk [vmem:[%s1177_s5 + $0xa0] sm:$0xff] %vm92_vm0, %v536_v24  ;;  %v539_v28 = vadd.f32 %v1010_v44, %v538_v27 }
 0x1e8   :  { %605 = vst.msk [vmem:[%s1177_s5 + $0xb8] sm:$0xff] %vm92_vm0, %v547_v26 }
 0x1e9   :  { %603 = vst.msk [vmem:[%s1177_s5 + $0xa8] sm:$0xff] %vm92_vm0, %v539_v28 }
 0x1eb   :  { %v766_v29 = vpop.f32.mrb[20].mxu1 }
 0x1ec   :  { %v560_v30 = vadd.f32 %v766_v29, %v1010_v44  ;;  %v551_v31 = vpop.f32.mrb[21].mxu1 }
 0x1ed   :  { %v552_v32 = vadd.f32 %v1010_v44, %v551_v31  ;;  %v767_v33 = vpop.f32.mrb[22].mxu1 }
 0x1ee   :  { %608 = vst.msk [vmem:[%s1177_s5 + $0xd0] sm:$0xff] %vm92_vm0, %v560_v30  ;;  %v563_v34 = vadd.f32 %v767_v33, %v1010_v44  ;;  %v554_v35 = vpop.f32.mrb[23].mxu1 }
 0x1ef   :  { %606 = vst.msk [vmem:[%s1177_s5 + $0xc0] sm:$0xff] %vm92_vm0, %v552_v32  ;;  %v555_v36 = vadd.f32 %v1010_v44, %v554_v35 }
 0x1f0   :  { %609 = vst.msk [vmem:[%s1177_s5 + $0xd8] sm:$0xff] %vm92_vm0, %v563_v34 }
 0x1f1   :  { %607 = vst.msk [vmem:[%s1177_s5 + $0xc8] sm:$0xff] %vm92_vm0, %v555_v36 }
 0x1f3   :  { %v770_v37 = vpop.f32.mrb[24].mxu1 }
 0x1f4   :  { %v576_v38 = vadd.f32 %v770_v37, %v1010_v44  ;;  %v567_v39 = vpop.f32.mrb[25].mxu1 }
 0x1f5   :  { %v568_v40 = vadd.f32 %v1010_v44, %v567_v39  ;;  %v771_v41 = vpop.f32.mrb[26].mxu1 }
 0x1f6   :  { %612 = vst.msk [vmem:[%s1177_s5 + $0xf0] sm:$0xff] %vm92_vm0, %v576_v38  ;;  %v579_v42 = vadd.f32 %v771_v41, %v1010_v44  ;;  %v570_v43 = vpop.f32.mrb[27].mxu1 }
 0x1f7   :  { %610 = vst.msk [vmem:[%s1177_s5 + $0xe0] sm:$0xff] %vm92_vm0, %v568_v40  ;;  %v571_v45 = vadd.f32 %v1010_v44, %v570_v43 }
 0x1f8   :  { %613 = vst.msk [vmem:[%s1177_s5 + $0xf8] sm:$0xff] %vm92_vm0, %v579_v42 }
 0x1f9   :  { %611 = vst.msk [vmem:[%s1177_s5 + $0xe8] sm:$0xff] %vm92_vm0, %v571_v45 }

</bundles_post_ra>
